<compile_context>
chip_gen: v6e
topology: v6e:2x2x1
jax: 0.10.0
libtpu: 0.0.40
codegen_flags: <defaults>
</compile_context>

<pallas_src>
import math

import jax
import jax.numpy as jnp
from jax.experimental import pallas as pl
from jax.experimental.pallas import tpu as pltpu


def _s2d_kernel(a_ref, x_ref, o_ref):
    # a_ref: (n, TL)  attention columns for TL unique output rows (L-layout,
    #                 no wrapper transpose; tile_l sits on the lane axis)
    # x_ref: (n, Dp)  dense features for this batch element (Dp = padded D)
    # o_ref: (TL, Dp) reconstructed output tile (lane-dense)
    a = a_ref[...].astype(jnp.float32)

    # Per-output-row min-max normalization over the token axis (axis 0 here,
    # cross-sublane reduces on the XLU; tile_l stays on lanes for the VPU/EUP).
    max_v = jnp.max(a, axis=0, keepdims=True)          # (1, TL)
    min_v = jnp.min(a, axis=0, keepdims=True)          # (1, TL)
    # Exact reciprocal: only one value per output row, and it scales the
    # softmax *logits*, so keep it precise.  NOTE: constant columns
    # (max == min) produce inf/NaN, intentionally matching PyTorch.
    inv_range = 1.0 / (max_v - min_v)
    a = (a - min_v) * inv_range

    # Softmax over the token axis.  After min-max normalization the per-row
    # max is exactly 1.0, so shift by the constant 1.0 instead of paying a
    # second cross-sublane max reduction.
    e = jnp.exp(a - 1.0)
    inv_sum = pl.reciprocal(jnp.sum(e, axis=0, keepdims=True), approx=True)
    p = e * inv_sum                                     # (n, TL)

    # (n, TL)^T @ (n, Dp) on the MXU via dot_general contracting dim 0 of both
    # operands (MXU handles the transposed LHS natively -> no relayout).
    # Only pack p down to x's dtype when x is sub-f32 (bf16 full-rate MXU);
    # for f32 x (and small n) the pack would be pure VALU cost.
    lhs = p if x_ref.dtype == jnp.float32 else p.astype(x_ref.dtype)
    o = jax.lax.dot_general(
        lhs, x_ref[...],
        dimension_numbers=(((0,), (0,)), ((), ())),
        preferred_element_type=jnp.float32)
    o_ref[...] = o.astype(o_ref.dtype)


def _round_up(v, m):
    return (v + m - 1) // m * m


def _pick_tile_l(L, B, n, Dp, a_item, x_item, vmem_budget):
    """Derive the L-tile from the VMEM budget and the actual n / Dp.

    The attn block is (n, tile_l) and the out block is (tile_l, Dp), both
    double-buffered; the x block (n, Dp) is resident (counted x2 to be safe).
    A tile smaller than L must be a multiple of 128 on the lane axis
    ((8,128) rule on the attn block's last dim).
    """
    resident = 2 * n * Dp * x_item
    per_row = 2 * (n * a_item + Dp * x_item)
    cap = max((vmem_budget - resident) // max(per_row, 1), 128)
    if L <= cap:
        return L  # full extent: fewest grid steps (~0.35us/step overhead)
    cands = [t for t in range(128, L, 128) if L % t == 0 and t <= cap]
    if not cands:
        return L  # no legal smaller tile; fall back to full extent
    if B == 1:
        # v7x has 2 TensorCores: with B == 1 prefer an even number of l-steps
        # so the "parallel" l axis splits evenly across cores.
        even = [t for t in cands if (L // t) % 2 == 0]
        if even:
            return max(even)
    return max(cands)


def s2d_adapter(x, attn_map, scale_size, *, tile_l=None):
    """Pallas implementation of S2DAdapter.forward.

    x:        (B, n, D)
    attn_map: (B, n, L) with L a perfect square
    returns:  (B, scale_size**2, D)
    """
    B, n, L = attn_map.shape
    edge = int(math.sqrt(L))
    assert edge * edge == L, "last dim of attn_map must be a perfect square"
    S = scale_size * scale_size
    D = x.shape[-1]

    # Lane-dense output: zero-pad the feature dim of x (the small operand) up
    # to a multiple of 128 so the kernel's output stores are unmasked vst.
    Dp = D if D % 128 == 0 else _round_up(D, 128)
    x_in = x if Dp == D else jnp.pad(x, ((0, 0), (0, 0), (0, Dp - D)))

    # Generation-aware VMEM budget (v7x: 64 MiB physical; v5e/v6e: 128 MiB).
    try:
        vmem_cap = int(pltpu.get_tpu_info().vmem_capacity_bytes)
    except Exception:  # pragma: no cover - conservative fallback (v7x-sized)
        vmem_cap = 64 << 20
    vmem_budget = (vmem_cap * 3) // 4

    a_item = attn_map.dtype.itemsize
    x_item = x_in.dtype.itemsize
    if tile_l is None:
        tile_l = _pick_tile_l(L, B, n, Dp, a_item, x_item, vmem_budget)
    assert L % tile_l == 0 and (tile_l % 128 == 0 or tile_l == L)

    # Explicit VMEM limit: double-buffered attn/out tiles + resident x block,
    # with margin, clamped to the per-generation budget.
    per_step = 2 * tile_l * (n * a_item + Dp * x_item) + 2 * n * Dp * x_item
    vmem_limit = int(max(min(per_step + (4 << 20), vmem_budget), 16 << 20))

    out_l = pl.pallas_call(
        _s2d_kernel,
        out_shape=jax.ShapeDtypeStruct((B, L, Dp), x.dtype),
        grid_spec=pltpu.PrefetchScalarGridSpec(
            num_scalar_prefetch=0,
            grid=(B, L // tile_l),
            in_specs=[
                # attn_map consumed untransposed: (n, tile_l) block per step.
                pl.BlockSpec((None, n, tile_l), lambda b, l: (b, 0, l)),
                # x block index is constant in l -> stays resident across L-tiles.
                pl.BlockSpec((None, n, Dp), lambda b, l: (b, 0, 0)),
            ],
            out_specs=pl.BlockSpec((None, tile_l, Dp), lambda b, l: (b, l, 0)),
        ),
        compiler_params=pltpu.CompilerParams(
            dimension_semantics=("parallel", "parallel"),
            vmem_limit_bytes=vmem_limit,
        ),
    )(attn_map, x_in)                                   # (B, L, Dp)

    if Dp != D:
        out_l = out_l[..., :D]                          # drop pad before upsample

    # Nearest-neighbor upsample of the OUTPUT rows (PyTorch F.interpolate
    # 'nearest': src = floor(dst * in / out)).
    if scale_size % edge == 0:
        # uniform k-fold replication: broadcast instead of gather (cheaper HLO)
        k = scale_size // edge
        img = out_l.reshape(B, edge, edge, D)
        img = jnp.broadcast_to(img[:, :, None, :, None, :],
                               (B, edge, k, edge, k, D))
        return img.reshape(B, S, D)
    src = (jnp.arange(scale_size) * edge) // scale_size     # (scale,)
    flat_idx = (src[:, None] * edge + src[None, :]).reshape(-1)  # (S,)
    return jnp.take(out_l, flat_idx, axis=1)                 # (B, S, D)


def _reference(x, attn_map, scale_size):
    """Pure-JAX reference mirroring the PyTorch forward."""
    B, n, L = attn_map.shape
    edge = int(math.sqrt(L))
    src = (jnp.arange(scale_size) * edge) // scale_size
    flat_idx = (src[:, None] * edge + src[None, :]).reshape(-1)
    a = jnp.transpose(jnp.take(attn_map, flat_idx, axis=-1), (0, 2, 1))  # (B,S,n)
    max_v = jnp.max(a, axis=-1, keepdims=True)
    min_v = jnp.min(a, axis=-1, keepdims=True)
    a = (a - min_v) / (max_v - min_v)
    a = jax.nn.softmax(a, axis=-1)
    return jnp.einsum("bsn,bnd->bsd", a, x, precision=jax.lax.Precision.HIGHEST)


if __name__ == "__main__":
    # small, module-consistent shapes
    B, n, edge, D = 2, 16, 4, 32
    L = edge * edge
    scale_size = 8

    key = jax.random.PRNGKey(0)
    kx, ka = jax.random.split(key)
    x = jax.random.normal(kx, (B, n, D), dtype=jnp.float32)
    attn_map = jax.random.uniform(ka, (B, n, L), dtype=jnp.float32)

    out = s2d_adapter(x, attn_map, scale_size)
    out = jax.block_until_ready(out)

    ref = _reference(x, attn_map, scale_size)
    assert out.shape == (B, scale_size * scale_size, D)
    # tolerance: softmax denominator uses the EUP approx reciprocal
    assert jnp.allclose(out, ref, atol=2e-3, rtol=2e-3)

    print("KERNEL_OK")
</pallas_src>

<mosaic_0001>
module attributes {stable_mosaic.version = 11 : i64} {
  func.func @_s2d_kernel(%arg0: i32, %arg1: i32, %arg2: memref<1x16x16xf32, #tpu.memory_space<vmem>>, %arg3: memref<1x16x128xf32, #tpu.memory_space<vmem>>, %arg4: memref<1x16x128xf32, #tpu.memory_space<vmem>>) attributes {dimension_semantics = [#tpu.dimension_semantics<parallel>, #tpu.dimension_semantics<parallel>], iteration_bounds = array<i64: 2, 1>, scalar_prefetch = 0 : i64, scratch_operands = 0 : i64, tpu.core_type = #tpu.core_type<tc>, window_params = [{transform_indices = @transform_0, window_bounds = array<i64: 1, 16, 16>}, {transform_indices = @transform_1, window_bounds = array<i64: 1, 16, 128>}, {transform_indices = @transform_2, window_bounds = array<i64: 1, 16, 128>}]} {
    %c0 = arith.constant 0 : index
    %c0_0 = arith.constant 0 : index
    %c0_1 = arith.constant 0 : index
    %0 = vector.load %arg2[%c0, %c0_0, %c0_1] : memref<1x16x16xf32, #tpu.memory_space<vmem>>, vector<1x16x16xf32>
    %1 = vector.shape_cast %0 : vector<1x16x16xf32> to vector<16x16xf32>
    %cst = arith.constant dense<0xFF800000> : vector<16xf32>
    %2 = vector.multi_reduction <maximumf>, %1, %cst [0] : vector<16x16xf32> to vector<16xf32>
    %3 = vector.shape_cast %2 : vector<16xf32> to vector<1x16xf32>
    %cst_2 = arith.constant dense<0x7F800000> : vector<16xf32>
    %4 = vector.multi_reduction <minimumf>, %1, %cst_2 [0] : vector<16x16xf32> to vector<16xf32>
    %5 = vector.shape_cast %4 : vector<16xf32> to vector<1x16xf32>
    %6 = arith.subf %3, %5 : vector<1x16xf32>
    %cst_3 = arith.constant 1.000000e+00 : f32
    %7 = vector.broadcast %cst_3 : f32 to vector<1x16xf32>
    %8 = arith.divf %7, %6 : vector<1x16xf32>
    %9 = vector.broadcast %5 : vector<1x16xf32> to vector<16x16xf32>
    %10 = arith.subf %1, %9 : vector<16x16xf32>
    %11 = vector.broadcast %8 : vector<1x16xf32> to vector<16x16xf32>
    %12 = arith.mulf %10, %11 : vector<16x16xf32>
    %cst_4 = arith.constant 1.000000e+00 : f32
    %13 = vector.broadcast %cst_4 : f32 to vector<16x16xf32>
    %14 = arith.subf %12, %13 : vector<16x16xf32>
    %15 = math.exp %14 : vector<16x16xf32>
    %cst_5 = arith.constant dense<0.000000e+00> : vector<16xf32>
    %16 = vector.multi_reduction <add>, %15, %cst_5 [0] : vector<16x16xf32> to vector<16xf32>
    %17 = vector.shape_cast %16 : vector<16xf32> to vector<1x16xf32>
    %18 = tpu.reciprocal %17 {approx = true} : vector<1x16xf32> -> vector<1x16xf32>
    %19 = vector.broadcast %18 : vector<1x16xf32> to vector<16x16xf32>
    %20 = arith.mulf %15, %19 : vector<16x16xf32>
    %c0_6 = arith.constant 0 : index
    %c0_7 = arith.constant 0 : index
    %c0_8 = arith.constant 0 : index
    %21 = vector.load %arg3[%c0_6, %c0_7, %c0_8] : memref<1x16x128xf32, #tpu.memory_space<vmem>>, vector<1x16x128xf32>
    %22 = vector.shape_cast %21 : vector<1x16x128xf32> to vector<16x128xf32>
    %cst_9 = arith.constant dense<0.000000e+00> : vector<16x128xf32>
    %23 = tpu.matmul %20, %22, %cst_9 {dimension_numbers = #tpu.dot_dimension_numbers<[0], [0], [1], [1], [0, 1, 1, 1], [], []>} : vector<16x16xf32>, vector<16x128xf32>, vector<16x128xf32> -> vector<16x128xf32>
    %c0_10 = arith.constant 0 : index
    %c0_11 = arith.constant 0 : index
    %c0_12 = arith.constant 0 : index
    %24 = vector.load %arg4[%c0_10, %c0_11, %c0_12] : memref<1x16x128xf32, #tpu.memory_space<vmem>>, vector<1x16x128xf32>
    %25 = vector.shape_cast %24 : vector<1x16x128xf32> to vector<16x128xf32>
    %26 = vector.shape_cast %23 : vector<16x128xf32> to vector<1x16x128xf32>
    tpu.vector_store %arg4[%c0_10, %c0_11, %c0_12], %26 {strides = array<i32>} : memref<1x16x128xf32, #tpu.memory_space<vmem>>, vector<1x16x128xf32>,
    return
  }
  func.func @transform_0(%arg0: i32, %arg1: i32) -> (i32, i32, i32) {
    %c0_i32 = arith.constant 0 : i32
    %c0_i32_0 = arith.constant 0 : i32
    return %arg0, %c0_i32, %arg1 : i32, i32, i32
  }
  func.func @transform_1(%arg0: i32, %arg1: i32) -> (i32, i32, i32) {
    %c0_i32 = arith.constant 0 : i32
    %c0_i32_0 = arith.constant 0 : i32
    %c0_i32_1 = arith.constant 0 : i32
    return %arg0, %c0_i32, %c0_i32_0 : i32, i32, i32
  }
  func.func @transform_2(%arg0: i32, %arg1: i32) -> (i32, i32, i32) {
    %c0_i32 = arith.constant 0 : i32
    %c0_i32_0 = arith.constant 0 : i32
    return %arg0, %arg1, %c0_i32 : i32, i32, i32
  }
}

</mosaic_0001>

<bundles_post_ra>
// kernel: tpu_custom_call.1
= control target key start
LH: loop header
LB: loop body
LE: loop exit
PB: predicated region body
PF: predicated region fallthrough
CT: control target
= control target key end

     0   :  { %7 = vsyncpa [#allocation3], 0  ;;  %s987_s0 = inlined_call_operand.hbm [shape: f32[2,16,16], index: 0, kind: input, shape index: {}]   ;;  %s988_s1 = inlined_call_operand.hbm [shape: f32[2,16,128], index: 1, kind: input, shape index: {}]   ;;  %s989_s2 = inlined_call_operand.hbm [shape: f32[2,16,128], index: 2, kind: output, shape index: {}]  }
   0x1   :  { %9 = vsyncpa [#allocation3 + $0x1], 0 }
   0x2   :  { %10 = vsyncpa [#allocation6], 0 }
   0x3   :  { %12 = vsyncpa [#allocation6 + $0x1], 0 }
   0x4   :  { %13 = vsyncpa [#allocation4], 0 }
   0x5   :  { %15 = vsyncpa [#allocation4 + $0x1], 0  ;;  %s789_s9 = smov 0   ;;  %s791_s10 = smov 0  }
   0x6   :  { %s793_s11 = smov 0   ;;  %s795_s12 = smov 0  }
   0x7   :  { %s797_s13 = smov 0   ;;  %s799_s14 = smov 0  }
   0x8 LB: > { %s508_s15 = sadd.s32 4294967295, %s765_s14   ;;  %s509_s16 = sadd.s32 4294967294, %s765_s14   ;;  %s765_s14 = sphi %s799_s14, %s21_s14   ;;  %s761_s13 = sphi %s797_s13, %s1000_s13   ;;  %s757_s12 = sphi %s795_s12, %s999_s12   ;;  %s753_s11 = sphi %s793_s11, %s998_s11   ;;  %s749_s10 = sphi %s791_s10, %s997_s10   ;;  %s745_s9 = sphi %s789_s9, %s996_s9  }
   0x9   : > { %s33_s17 = sadd.s32 1, %s761_s13  ;;  %s42_s18 = sadd.s32 1, %s753_s11 }
   0xa   : > { %p35_p0 = scmp.ge.s32.totalorder %s33_s17, 2  ;;  %p49_p1 = scmp.ne.s32.totalorder %s753_s11, %s749_s10 }
   0xb   : > { %p50_p2 = scmp.eq.s32.totalorder %s765_s14, 0  ;;  %p55_p3 = scmp.ne.s32.totalorder %s749_s10, %s745_s9 }
   0xc   : > { %s1002_s17 = smov (%p35_p0, %s33_s17), 0  ;;  %p56_p5 = scmp.eq.s32.totalorder %s508_s15, 0 }
   0xd   : > { %p830_p4 = por %p50_p2, %p49_p1  ;;  %s37_s20 = ssub.s32 %s761_s13, %s1002_s17 }
   0xe   : > { %p107_p6 = scmp.eq.s32.totalorder %s508_s15, 1  ;;  %p40_p7 = scmp.eq.s32.totalorder %s37_s20, 0 }
   0xf   : > { %p836_p8 = por %p56_p5, %p55_p3  ;;  %p113_p10 = scmp.eq.s32.totalorder %s509_s16, 1 }
  0x10   : > { %p840_p9 = por %p107_p6, %p49_p1  ;;  %p511_p12 = scmp.ge.s32.totalorder %s765_s14, 2 }
  0x11   : > { %s845_s23 = scalar_select %p40_p7, %s753_s11, %s42_s18  }
  0x12   : > { %p847_p11 = por %p113_p10, %p55_p3  ;;  %p562_p13 = scmp.lt.s32.totalorder %s765_s14, 2 }
  0x13   : > { %s854_s25 = sand.u32 1, %s753_s11   ;;  %s531_s27 = sshll.u32 %s761_s13, 8 }
  0x14   : > { %s512_s26 = sshll.u32 %s854_s25, 4  ;;  %s144_s30 = scalar_lea.hbm %s987_s0, %s531_s27 }
  0x15   : > { %s137_s3 = scalar_lea.vmem [#allocation2], %s512_s26  ;;  %p867_p0 = pnand %p562_p13, %p830_p4 }
  0x16   : > { %s145_s4 = sshll.u32 %s137_s3, 4  ;;  %p518_p1 = scmp.ge.s32.totalorder %s765_s14, 1  ;;  %s146_s4 = int_to_ptr.vmem [resolvable:$true] %s145_s4 }
  0x17   : > { %s134_s6 = scalar_lea.sflag [#allocation3], %s854_s25  ;;  %p627_p2 = pneg %p867_p0 }
  0x18   : > { %s638_s7 = scalar_lea.vmem %s146_s4, 256  ;;  %s767_s8 = smov [#allocation2]  }
  0x19   : > { %p639_p3 = scmp.ne.s32.totalorder %s146_s4, %s638_s7  ;;  %s643_s15 = sshll.u32 %s767_s8, 4  ;;  %s644_s15 = int_to_ptr.vmem [resolvable:$false] %s643_s15 }
  0x1a   : > { %s645_s16 = scalar_lea.vmem %s644_s15, 512  ;;  %p646_p4 = scmp.lt.s32.totalorder %s146_s4, %s644_s15 }
  0x1b   : > { %p641_p5 = pnand %p639_p3, %p627_p2  ;;  %p647_p7 = scmp.lt.s32.totalorder %s645_s16, %s638_s7 }
  0x1d   : > { %p642_p6 = pneg %p641_p5  ;;  %p648_p10 = por %p647_p7, %p646_p4 }
  0x1f   : > { %p649_p13 = pnand %p648_p10, %p642_p6 }
  0x21   : > { %652 = shalt.err (!%p649_p13)
}
  0x22   : > { %s768_s18 = smov 128   ;;  %s769_s19 = smov 8  }
  0x23   : > { %554 = dma.hbm_to_vmem [thread:$0]  (!%p867_p0), %s144_s30, 256, %s146_s4, %s134_s6, %s768_s18, %s768_s18, %s769_s19  }
  0x24   : > { %p174_p3 = scmp.lt.s32.totalorder %s765_s14, 3  ;;  %s165_s29 = scalar_lea.hbm %s988_s1, %s531_s27 }
  0x25   : > { %s159_s7 = scalar_lea.vmem [#allocation5], %s512_s26  ;;  %s156_s15 = scalar_lea.sflag [#allocation6], %s854_s25 }
  0x26   : > { %p888_p5 = pnand %p518_p1, %p174_p3  ;;  %s166_s8 = sshll.u32 %s159_s7, 4  ;;  %s167_s8 = int_to_ptr.vmem [resolvable:$true] %s166_s8 }
  0x27   : > { %s666_s16 = scalar_lea.vmem %s167_s8, 256  ;;  %s770_s30 = smov [#allocation5]  }
  0x28   : > { %p667_p6 = scmp.ne.s32.totalorder %s167_s8, %s666_s16  ;;  %s671_s4 = sshll.u32 %s770_s30, 4  ;;  %s672_s4 = int_to_ptr.vmem [resolvable:$false] %s671_s4 }
  0x29   : > { %s673_s27 = scalar_lea.vmem %s672_s4, 512  ;;  %p674_p10 = scmp.lt.s32.totalorder %s167_s8, %s672_s4 }
  0x2a   : > { %p669_p4 = pnand %p667_p6, %p627_p2  ;;  %p675_p1 = scmp.lt.s32.totalorder %s673_s27, %s666_s16 }
  0x2c   : > { %p670_p7 = pneg %p669_p4  ;;  %p676_p13 = por %p675_p1, %p674_p10 }
  0x2e   : > { %p677_p3 = pnand %p676_p13, %p670_p7 }
  0x30   : > { %680 = shalt.err (!%p677_p3)
}
  0x31   : > { %557 = dma.hbm_to_vmem [thread:$0]  (!%p867_p0), %s165_s29, 256, %s167_s8, %s156_s15, %s768_s18, %s768_s18, %s769_s19  }
  0x32   : > { %178 = sbr.rel (%p888_p5) target bundleno = 480 (0x1e0), region = 28  ;;  %s903_s25 = sand.u32 (!%p888_p5), 1, %s749_s10  }
  0x33   : > { %s906_s26 = sshll.u32 (!%p888_p5), %s903_s25, 4  ;;  %s181_s6 = scalar_lea.sflag (!%p888_p5), [#allocation3], %s903_s25 }
  0x34   : > { %s184_s20 = scalar_lea.vmem (!%p888_p5), [#allocation2], %s906_s26 }
  0x37   : > { %732 = dma.done.wait (%p836_p8), %s181_s6, 256  }
  0x38   : > { %734 = vsyncadd (%p836_p8), %s181_s6, 4294967040  ;;  %s190_s5 = scalar_lea.sflag [#allocation6], %s903_s25  ;;  %s193_s18 = scalar_lea.vmem [#allocation5], %s906_s26 }
  0x39   : > { %736 = dma.done.wait (%p836_p8), %s190_s5, 256  }
  0x3a   : > { %738 = vsyncadd (%p836_p8), %s190_s5, 4294967040  ;;  %vm222_vm0 = vcmask 130048   ;;  %v220_v0 = vld [vmem:[%s184_s20] sm:$0xff]  ;;  %v221_v1 = vld [vmem:[%s184_s20 + $0x8] sm:$0xff]  ;;  %s218_s21 = scalar_lea.vmem [#allocation7], %s906_s26  ;;  %s533_s28 = sshll.u32 %s757_s12, 8 }
  0x3b   : > { %v223_v2 = vsel %vm222_vm0, %v220_v0, -inf  ;;  %v224_v3 = vsel %vm222_vm0, %v221_v1, -inf  ;;  %v232_v4 = vsel %vm222_vm0, %v220_v0, inf  ;;  %v233_v5 = vsel %vm222_vm0, %v221_v1, inf  ;;  %v267_v41 = vld [vmem:[%s193_s18 + $0x8] sm:$0xff]  ;;  %v266_v43 = vld [vmem:[%s193_s18] sm:$0xff]  ;;  %s939_s7 = scalar_lea.hbm %s989_s2, %s533_s28 }
  0x3c   : > { %v225_v6 = vmax.f32 %v223_v2, %v224_v3  ;;  %v234_v7 = vmin.f32 %v232_v4, %v233_v5  ;;  %538 = vmatprep.subr.mxu0 %v267_v41  ;;  %s399_s19 = sshll.u32 %s218_s21, 4  ;;  %s384_s8 = scalar_lea.sflag [#allocation4], %s903_s25  ;;  %s934_s19 = int_to_ptr.vmem [resolvable:$true] %s399_s19 }
  0x3d   : > { %539 = vmatpush3.msra.mxu0 %v267_v41  ;;  %s681_s15 = scalar_lea.vmem %s934_s19, 256  ;;  %s771_s12 = smov [#allocation7]  }
  0x3e   : > { %v226_v8 = vrot.slane %v225_v6, 4  ;;  %v235_v9 = vrot.slane %v234_v7, 4  ;;  %540 = vmatprep.subr.mxu0 %v266_v43  ;;  %p682_p8 = scmp.ne.s32.totalorder %s934_s19, %s681_s15  ;;  %s685_s16 = sshll.u32 %s771_s12, 4  ;;  %s686_s16 = int_to_ptr.vmem [resolvable:$false] %s685_s16 }
  0x3f   : > { %541 = vmatpush3.msra.mxu0 %v266_v43  ;;  %s687_s30 = scalar_lea.vmem %s686_s16, 512  ;;  %p688_p5 = scmp.lt.s32.totalorder %s934_s19, %s686_s16 }
  0x40   : > { %v227_v10 = vmax.f32 %v225_v6, %v226_v8  ;;  %v236_v11 = vmin.f32 %v234_v7, %v235_v9  ;;  %p683_p0 = pnand %p682_p8, %p840_p9  ;;  %p689_p6 = scmp.lt.s32.totalorder %s687_s30, %s681_s15 }
  0x42   : > { %v228_v12 = vrot.slane %v227_v10, 2  ;;  %v237_v13 = vrot.slane %v236_v11, 2  ;;  %p684_p2 = pneg %p683_p0  ;;  %p690_p4 = por %p689_p6, %p688_p5 }
  0x44   : > { %v229_v14 = vmax.f32 %v227_v10, %v228_v12  ;;  %v238_v15 = vmin.f32 %v236_v11, %v237_v13  ;;  %p691_p7 = pnand %p690_p4, %p684_p2 }
  0x46   : > { %v230_v16 = vrot.slane %v229_v14, 1  ;;  %v239_v17 = vrot.slane %v238_v15, 1 }
  0x48   : > { %v231_v18 = vmax.f32 %v229_v14, %v230_v16  ;;  %v240_v19 = vmin.f32 %v238_v15, %v239_v17 }
  0x4a   : > { %v241_v20 = vsub.f32 %v231_v18, %v240_v19  ;;  %v244_v21 = vsub.f32 %v220_v0, %v240_v19  ;;  %v245_v22 = vsub.f32 %v221_v1, %v240_v19 }
  0x4c   : > { %617 = vrcp.f32 %v241_v20 }
  0x59   : > { %v618_v23 = vpop.eup %617 }
  0x5a   : > { %v246_v24 = vmul.f32 %v618_v23, %v244_v21  ;;  %v247_v25 = vmul.f32 %v618_v23, %v245_v22 }
  0x5c   : > { %v522_v26 = vadd.f32 -1.0, %v246_v24  ;;  %v523_v27 = vadd.f32 -1.0, %v247_v25 }
  0x5e   : > { %v250_v28 = vmul.f32 1.442695, %v522_v26  ;;  %v252_v29 = vmul.f32 1.442695, %v523_v27 }
  0x60   : > { %619 = vpow2.f32 %v250_v28 }
  0x61   : > { %621 = vpow2.f32 %v252_v29 }
  0x6d   : > { %v620_v30 = vpop.eup %619 }
  0x6e   : > { %v622_v31 = vpop.eup %621  ;;  %v254_v32 = vsel %vm222_vm0, %v620_v30, 0.0 }
  0x6f   : > { %v255_v33 = vsel %vm222_vm0, %v622_v31, 0.0 }
  0x70   : > { %v256_v34 = vadd.f32 %v255_v33, %v254_v32 }
  0x72   : > { %v257_v35 = vrot.slane %v256_v34, 4 }
  0x74   : > { %v258_v36 = vadd.f32 %v257_v35, %v256_v34 }
  0x76   : > { %v259_v37 = vrot.slane %v258_v36, 2 }
  0x78   : > { %v260_v38 = vadd.f32 %v259_v37, %v258_v36 }
  0x7a   : > { %v261_v39 = vrot.slane %v260_v38, 1 }
  0x7c   : > { %v262_v40 = vadd.f32 %v261_v39, %v260_v38 }
  0x7e   : > { %623 = vrcp.f32 %v262_v40 }
  0x8b   : > { %v624_v42 = vpop.eup %623 }
  0x8c   : > { %v264_v44 = vmul.f32 %v624_v42, %v620_v30  ;;  %v265_v45 = vmul.f32 %v624_v42, %v622_v31 }
  0x8e   : > { %268 = vxpose.xlu0.b32.start [1/2] (short) (narrow) %v264_v44, 16 }
  0x92   : > { %269 = vxpose.xlu0.b32.end [2/2] (short) (narrow) %v265_v45, 16 }
 0x10a   : > { %v284_v46 = vpop.trf.xlu0 }
 0x10b   : > { %542 = vmatprep.mubr.msk.f32.mxu0 %vm222_vm0, %v284_v46 }
 0x10e   : > { %v285_v47 = vpop.trf.xlu0 }
 0x10f   : > { %543 = vmatmul.mubr.msk.f32.vlgmr.msra.gmra.mxu0 %vm222_vm0, %v285_v47 }
 0x1cf   : > { %v544_v48 = vpop.f32.mrf.mxu0 }
 0x1d0   : > { %382 = vst [vmem:[%s218_s21 + $0x8] sm:$0xff] %v544_v48 }
 0x1d1   : > { %v372_v49 = vpop.f32.mrf.mxu0 }
 0x1d2   : > { %381 = vst [vmem:[%s218_s21] sm:$0xff] %v372_v49 }
 0x1d3   : > { %694 = shalt.err (!%p691_p7)
}
 0x1d4   : > { %s695_s4 = scalar_lea.hbm %s939_s7, 256  ;;  %s699_s6 = scalar_lea.hbm %s989_s2, 512 }
 0x1d5   : > { %p696_p10 = scmp.ne.s32.totalorder %s939_s7, %s695_s4  ;;  %p700_p3 = scmp.lt.s32.totalorder %s939_s7, %s989_s2 }
 0x1d6   : > { %p701_p8 = scmp.lt.s32.totalorder %s699_s6, %s695_s4 }
 0x1d7   : > { %p697_p1 = pnand %p696_p10, %p840_p9 }
 0x1d8   : > { %p702_p0 = por %p701_p8, %p700_p3 }
 0x1d9   : > { %p698_p13 = pneg %p697_p1 }
 0x1db   : > { %p703_p2 = pnand %p702_p0, %p698_p13 }
 0x1dd   : > { %706 = shalt.err (!%p703_p2)
}
 0x1de   : > { %s772_s18 = smov 128   ;;  %s773_s21 = smov 8  }
 0x1df   : > { %549 = dma.vmem_to_hbm [thread:$0]  (%p840_p9), %s934_s19, 256, %s939_s7, %s384_s8, %s772_s18, %s772_s18, %s773_s21  }
 0x1e0 PF: > { %s414_s28 = sand.u32 1, %s745_s9   ;;  %p559_p5 = pnand %p511_p12, %p847_p11 }
 0x1e1   : > { %s415_s29 = scalar_lea.sflag [#allocation4], %s414_s28 }
 0x1e2   : > { %p560_p6 = pneg %p559_p5 }
 0x1e4   : > { %740 = dma.done.wait (%p560_p6), %s415_s29, 256  }
 0x1e5   : > { %742 = vsyncadd (%p560_p6), %s415_s29, 4294967040  ;;  %s21_s14 = sadd.s32 1, %s765_s14   ;;  %s996_s9 = smov %s749_s10 }
 0x1e6   : > { %p18_p4 = scmp.ge.s32.totalorder %s21_s14, 4   ;;  %s997_s10 = smov %s753_s11 }
 0x1e7   : > { %s998_s11 = smov %s845_s23  ;;  %s999_s12 = smov %s761_s13 }
 0x1e8   : > { %s1000_s13 = smov %s1002_s17  ;;  %20 = sbr.rel (!%p18_p4) target bundleno = 8 (0x8), region = 86 }
 0x1ed   :  { %420 = vsyncpa [#allocation3], 1 }
 0x1ee   :  { %422 = vsyncpa [#allocation3 + $0x1], 1 }
 0x1ef   :  { %423 = vsyncpa [#allocation6], 1 }
 0x1f0   :  { %425 = vsyncpa [#allocation6 + $0x1], 1 }
 0x1f1   :  { %426 = vsyncpa [#allocation4], 1 }
 0x1f2   :  { %428 = vsyncpa [#allocation4 + $0x1], 1 }

</bundles_post_ra>
